<compile_context>
chip_gen: v7x
topology: tpu7x:2x2x1
jax: 0.10.0
libtpu: 0.0.40
codegen_flags: <defaults>
</compile_context>

<pallas_src>
import functools
import math

import jax
import jax.numpy as jnp
from jax.experimental import pallas as pl
from jax.experimental.pallas import tpu as pltpu


def _shift_flat(xb, d, hw):
    """out[:, p] = xb[:, p + d] if 0 <= p + d < hw else 0   (d is a static int)."""
    if d == 0:
        return xb
    c = xb.shape[0]
    z = jnp.zeros((c, abs(d)), dtype=xb.dtype)
    if d > 0:
        return jnp.concatenate([xb[:, d:], z], axis=1)
    return jnp.concatenate([z, xb[:, :hw + d]], axis=1)


def _conv3x3_flat(x2d, wr, mnf, mnl, width):
    """3x3 / stride-1 / pad-1 conv on a (C, H*W) activation as ONE MXU matmul.

    x2d:  (cin, hw) f32, spatial flattened row-major on the lane dim.
    wr:   (cout, 9*cin) bf16, columns ordered (kh, kw, ci).
    mnf:  (1, hw) f32 mask, 1.0 where column != 0       (source mask for dw=+1).
    mnl:  (1, hw) f32 mask, 1.0 where column != width-1 (source mask for dw=-1).
    Returns (cout, hw) f32 (f32 accumulation on the MXU).
    """
    _, hw = x2d.shape
    # Column-halo masking hoisted out of the tap loop; one bf16 cast per copy.
    xb_c = x2d.astype(jnp.bfloat16)
    xb_nf = (x2d * mnf).astype(jnp.bfloat16)   # excludes col 0      -> dw = +1 taps
    xb_nl = (x2d * mnl).astype(jnp.bfloat16)   # excludes col W-1    -> dw = -1 taps
    srcs = {-1: xb_nl, 0: xb_c, 1: xb_nf}

    taps = []
    for dh in (-1, 0, 1):          # tap order (kh, kw) matches the weight reshape
        for dw in (-1, 0, 1):
            taps.append(_shift_flat(srcs[dw], dh * width + dw, hw))
    slab = jnp.concatenate(taps, axis=0)                                  # (9*cin, hw) bf16
    return jnp.dot(wr, slab, preferred_element_type=jnp.float32)          # (cout, hw) f32


def _group_norm_chw(y, mgrp_ref, gamma, beta, cg, eps):
    """GroupNorm of one sample laid out as (C, H*W): lane reductions + per-channel affine."""
    hw = y.shape[1]
    inv_cnt = 1.0 / float(hw * cg)
    ssum = jnp.sum(y, axis=1, keepdims=True)                              # (C, 1)
    ssq = jnp.sum(y * y, axis=1, keepdims=True)                           # (C, 1)
    if cg == 1:
        mean = ssum * inv_cnt
        ex2 = ssq * inv_cnt
    else:
        mgrp = mgrp_ref[...]                                              # (C, C) block-diag ones
        mean = jnp.dot(mgrp, ssum, preferred_element_type=jnp.float32) * inv_cnt
        ex2 = jnp.dot(mgrp, ssq, preferred_element_type=jnp.float32) * inv_cnt
    var = jnp.maximum(ex2 - mean * mean, 0.0)                             # clamp cancellation
    inv = jax.lax.rsqrt(var + eps)
    return (y - mean) * (inv * gamma) + beta


def _basic_block_kernel(x_ref, w1_ref, w2_ref, g1_ref, b1_ref, g2_ref, b2_ref,
                        mgrp_ref, mnf_ref, mnl_ref, o_ref, *, width, groups, eps):
    ns, c, hw = x_ref.shape
    cg = c // groups
    w1 = w1_ref[...]
    w2 = w2_ref[...]
    mnf = mnf_ref[...]
    mnl = mnl_ref[...]
    g1, b1 = g1_ref[...], b1_ref[...]
    g2, b2 = g2_ref[...], b2_ref[...]

    for s in range(ns):                                                   # static unrolled
        x2d = x_ref[s]                                                    # (C, hw) f32

        # conv1 + GN + ReLU   (intermediate stays in VMEM/vregs)
        y = _conv3x3_flat(x2d, w1, mnf, mnl, width)
        y = _group_norm_chw(y, mgrp_ref, g1, b1, cg, eps)
        y = jnp.maximum(y, 0.0)

        # conv2 + GN + residual add + ReLU
        z = _conv3x3_flat(y, w2, mnf, mnl, width)
        z = _group_norm_chw(z, mgrp_ref, g2, b2, cg, eps)
        z = jnp.maximum(z + x2d, 0.0)

        o_ref[s] = z                                                      # lane-dense store


def basic_block_forward(x_nchw, params, groups=32, eps=1e-5):
    """BasicBlock forward (stride=1, downsample=None). Input/output NCHW."""
    n, c, h, w = x_nchw.shape
    hw = h * w
    x = x_nchw.reshape(n, c, hw).astype(jnp.float32)                      # free reshape, no transpose

    cout = params["w1"].shape[0]
    if cout != c:
        raise ValueError("stride=1 / downsample=None BasicBlock requires cin == cout")
    if cout % groups != 0:
        raise ValueError("channels must be divisible by num_groups")
    cg = cout // groups

    # OIHW -> (Cout, kh, kw, Cin) -> (Cout, 9*Cin); bf16 operands, f32 MXU accumulation.
    w1 = jnp.transpose(params["w1"], (0, 2, 3, 1)).reshape(cout, 9 * c).astype(jnp.bfloat16)
    w2 = jnp.transpose(params["w2"], (0, 2, 3, 1)).reshape(cout, 9 * cout).astype(jnp.bfloat16)

    g1 = params["g1"].reshape(cout, 1).astype(jnp.float32)
    b1 = params["b1"].reshape(cout, 1).astype(jnp.float32)
    g2 = params["g2"].reshape(cout, 1).astype(jnp.float32)
    b2 = params["b2"].reshape(cout, 1).astype(jnp.float32)

    # Column-halo source masks (built once, outside the kernel).
    col = jnp.arange(hw, dtype=jnp.int32) % w
    mnf = (col != 0).astype(jnp.float32).reshape(1, hw)                   # not-first-column
    mnl = (col != (w - 1)).astype(jnp.float32).reshape(1, hw)             # not-last-column

    # Block-diagonal group-membership matrix (only read by the kernel when cg > 1).
    gid = jnp.arange(cout, dtype=jnp.int32) // cg
    mgrp = (gid[:, None] == gid[None, :]).astype(jnp.float32)             # (C, C)

    # >=2 samples per grid step for larger batches; keep grid >= 2 for v7x megacore.
    ns = 2 if (n % 2 == 0 and n > 2) else 1
    grid = (n // ns,)

    kernel = functools.partial(_basic_block_kernel, width=w, groups=groups, eps=eps)

    flops = n * 2 * (2 * cout * (9 * c) * hw)                             # two 3x3 convs
    bytes_accessed = (x.size + n * cout * hw) * 4 + (w1.size + w2.size) * 2

    def _rep2(i):
        return (0, 0)

    out = pl.pallas_call(
        kernel,
        out_shape=jax.ShapeDtypeStruct((n, cout, hw), jnp.float32),
        grid_spec=pltpu.PrefetchScalarGridSpec(
            num_scalar_prefetch=0,
            grid=grid,
            in_specs=[
                pl.BlockSpec((ns, c, hw), lambda i: (i, 0, 0)),
                pl.BlockSpec((cout, 9 * c), _rep2),
                pl.BlockSpec((cout, 9 * cout), _rep2),
                pl.BlockSpec((cout, 1), _rep2),
                pl.BlockSpec((cout, 1), _rep2),
                pl.BlockSpec((cout, 1), _rep2),
                pl.BlockSpec((cout, 1), _rep2),
                pl.BlockSpec((cout, cout), _rep2),
                pl.BlockSpec((1, hw), _rep2),
                pl.BlockSpec((1, hw), _rep2),
            ],
            out_specs=pl.BlockSpec((ns, cout, hw), lambda i: (i, 0, 0)),
        ),
        compiler_params=pltpu.CompilerParams(
            dimension_semantics=("parallel",),
            # Actual per-step footprint is well under 1 MiB (largest object is the
            # 144 KiB bf16 im2col slab); 8 MiB leaves headroom for compiler
            # temporaries while staying far below the 32 MiB scoped default and
            # the 64 MiB v7x physical VMEM.
            vmem_limit_bytes=8 << 20,
        ),
        cost_estimate=pl.CostEstimate(
            flops=flops,
            transcendentals=2 * n * cout,
            bytes_accessed=bytes_accessed,
        ),
    )(x, w1, w2, g1, b1, g2, b2, mgrp, mnf, mnl)

    return out.reshape(n, cout, h, w)                                     # free reshape back to NCHW


def reference_forward(x, params, groups=32, eps=1e-5):
    """Pure-JAX NCHW reference matching the PyTorch module semantics."""
    def conv(a, wt):
        return jax.lax.conv_general_dilated(
            a, wt, window_strides=(1, 1), padding="SAME",
            dimension_numbers=("NCHW", "OIHW", "NCHW"),
            precision=jax.lax.Precision.HIGHEST)

    def gn(y, gamma, beta):
        n, c, h, w = y.shape
        cg = c // groups
        yg = y.reshape(n, groups, cg, h, w)
        m = yg.mean(axis=(2, 3, 4), keepdims=True)
        v = ((yg - m) ** 2).mean(axis=(2, 3, 4), keepdims=True)
        yn = ((yg - m) / jnp.sqrt(v + eps)).reshape(n, c, h, w)
        return yn * gamma.reshape(1, c, 1, 1) + beta.reshape(1, c, 1, 1)

    out = jnp.maximum(gn(conv(x, params["w1"]), params["g1"], params["b1"]), 0.0)
    out = gn(conv(out, params["w2"]), params["g2"], params["b2"]) + x
    return jnp.maximum(out, 0.0)


if __name__ == "__main__":
    # GroupNorm uses num_groups=32, so channels must be a multiple of 32.
    N, C, H, W = 2, 32, 16, 16          # inplanes = planes = 32, stride=1, downsample=None
    key = jax.random.PRNGKey(0)
    ks = jax.random.split(key, 8)
    x = jax.random.normal(ks[0], (N, C, H, W), jnp.float32)

    std = math.sqrt(2.0 / (C * 9))      # kaiming-normal-like deterministic synthetic init
    params = {
        "w1": jax.random.normal(ks[1], (C, C, 3, 3), jnp.float32) * std,  # OIHW (PyTorch)
        "w2": jax.random.normal(ks[2], (C, C, 3, 3), jnp.float32) * std,
        "g1": 1.0 + 0.1 * jax.random.normal(ks[3], (C,), jnp.float32),
        "b1": 0.1 * jax.random.normal(ks[4], (C,), jnp.float32),
        "g2": 1.0 + 0.1 * jax.random.normal(ks[5], (C,), jnp.float32),
        "b2": 0.1 * jax.random.normal(ks[6], (C,), jnp.float32),
    }

    out = jax.block_until_ready(jax.jit(basic_block_forward)(x, params))
    ref = reference_forward(x, params)

    assert out.shape == (N, C, H, W), out.shape
    max_err = float(jnp.max(jnp.abs(out - ref)))
    assert jnp.allclose(out, ref, atol=2e-2, rtol=2e-2), f"max_err={max_err}"
    print("KERNEL_OK")
</pallas_src>

<mosaic_0001>
module attributes {stable_mosaic.version = 11 : i64} {
  func.func @_basic_block_kernel(%arg0: i32, %arg1: memref<1x32x256xf32, #tpu.memory_space<vmem>>, %arg2: memref<32x288xbf16, #tpu.memory_space<vmem>>, %arg3: memref<32x288xbf16, #tpu.memory_space<vmem>>, %arg4: memref<32x1xf32, #tpu.memory_space<vmem>>, %arg5: memref<32x1xf32, #tpu.memory_space<vmem>>, %arg6: memref<32x1xf32, #tpu.memory_space<vmem>>, %arg7: memref<32x1xf32, #tpu.memory_space<vmem>>, %arg8: memref<32x32xf32, #tpu.memory_space<vmem>>, %arg9: memref<1x256xf32, #tpu.memory_space<vmem>>, %arg10: memref<1x256xf32, #tpu.memory_space<vmem>>, %arg11: memref<1x32x256xf32, #tpu.memory_space<vmem>>) attributes {dimension_semantics = [#tpu.dimension_semantics<parallel>], iteration_bounds = array<i64: 2>, scalar_prefetch = 0 : i64, scratch_operands = 0 : i64, tpu.core_type = #tpu.core_type<tc>, window_params = [{transform_indices = @transform_0, window_bounds = array<i64: 1, 32, 256>}, {pipeline_mode = #tpu.pipeline_mode<synchronous>, transform_indices = @transform_1, window_bounds = array<i64: 32, 288>}, {pipeline_mode = #tpu.pipeline_mode<synchronous>, transform_indices = @transform_2, window_bounds = array<i64: 32, 288>}, {pipeline_mode = #tpu.pipeline_mode<synchronous>, transform_indices = @transform_3, window_bounds = array<i64: 32, 1>}, {pipeline_mode = #tpu.pipeline_mode<synchronous>, transform_indices = @transform_4, window_bounds = array<i64: 32, 1>}, {pipeline_mode = #tpu.pipeline_mode<synchronous>, transform_indices = @transform_5, window_bounds = array<i64: 32, 1>}, {pipeline_mode = #tpu.pipeline_mode<synchronous>, transform_indices = @transform_6, window_bounds = array<i64: 32, 1>}, {pipeline_mode = #tpu.pipeline_mode<synchronous>, transform_indices = @transform_7, window_bounds = array<i64: 32, 32>}, {pipeline_mode = #tpu.pipeline_mode<synchronous>, transform_indices = @transform_8, window_bounds = array<i64: 1, 256>}, {pipeline_mode = #tpu.pipeline_mode<synchronous>, transform_indices = @transform_9, window_bounds = array<i64: 1, 256>}, {transform_indices = @transform_10, window_bounds = array<i64: 1, 32, 256>}]} {
    %c0 = arith.constant 0 : index
    %c0_0 = arith.constant 0 : index
    %0 = vector.load %arg2[%c0, %c0_0] : memref<32x288xbf16, #tpu.memory_space<vmem>>, vector<32x288xbf16>
    %c0_1 = arith.constant 0 : index
    %c0_2 = arith.constant 0 : index
    %1 = vector.load %arg3[%c0_1, %c0_2] : memref<32x288xbf16, #tpu.memory_space<vmem>>, vector<32x288xbf16>
    %c0_3 = arith.constant 0 : index
    %c0_4 = arith.constant 0 : index
    %2 = vector.load %arg9[%c0_3, %c0_4] : memref<1x256xf32, #tpu.memory_space<vmem>>, vector<1x256xf32>
    %c0_5 = arith.constant 0 : index
    %c0_6 = arith.constant 0 : index
    %3 = vector.load %arg10[%c0_5, %c0_6] : memref<1x256xf32, #tpu.memory_space<vmem>>, vector<1x256xf32>
    %c0_7 = arith.constant 0 : index
    %c0_8 = arith.constant 0 : index
    %4 = vector.load %arg4[%c0_7, %c0_8] : memref<32x1xf32, #tpu.memory_space<vmem>>, vector<32x1xf32>
    %c0_9 = arith.constant 0 : index
    %c0_10 = arith.constant 0 : index
    %5 = vector.load %arg5[%c0_9, %c0_10] : memref<32x1xf32, #tpu.memory_space<vmem>>, vector<32x1xf32>
    %c0_11 = arith.constant 0 : index
    %c0_12 = arith.constant 0 : index
    %6 = vector.load %arg6[%c0_11, %c0_12] : memref<32x1xf32, #tpu.memory_space<vmem>>, vector<32x1xf32>
    %c0_13 = arith.constant 0 : index
    %c0_14 = arith.constant 0 : index
    %7 = vector.load %arg7[%c0_13, %c0_14] : memref<32x1xf32, #tpu.memory_space<vmem>>, vector<32x1xf32>
    %c0_15 = arith.constant 0 : index
    %c0_16 = arith.constant 0 : index
    %c0_17 = arith.constant 0 : index
    %8 = vector.load %arg1[%c0_15, %c0_16, %c0_17] : memref<1x32x256xf32, #tpu.memory_space<vmem>>, vector<1x32x256xf32>
    %9 = vector.shape_cast %8 : vector<1x32x256xf32> to vector<32x256xf32>
    %10 = arith.truncf %9 : vector<32x256xf32> to vector<32x256xbf16>
    %11 = vector.broadcast %2 : vector<1x256xf32> to vector<32x256xf32>
    %12 = arith.mulf %9, %11 : vector<32x256xf32>
    %13 = arith.truncf %12 : vector<32x256xf32> to vector<32x256xbf16>
    %14 = vector.broadcast %3 : vector<1x256xf32> to vector<32x256xf32>
    %15 = arith.mulf %9, %14 : vector<32x256xf32>
    %16 = arith.truncf %15 : vector<32x256xf32> to vector<32x256xbf16>
    %cst = arith.constant 0.000000e+00 : bf16
    %17 = vector.broadcast %cst : bf16 to vector<32x17xbf16>
    %18 = vector.extract_strided_slice %16 {offsets = [0, 0], sizes = [32, 239], strides = [1, 1]} : vector<32x256xbf16> to vector<32x239xbf16>
    %19 = tpu.concatenate %17, %18 in 1 : vector<32x17xbf16>, vector<32x239xbf16> -> vector<32x256xbf16>
    %cst_18 = arith.constant 0.000000e+00 : bf16
    %20 = vector.broadcast %cst_18 : bf16 to vector<32x16xbf16>
    %21 = vector.extract_strided_slice %10 {offsets = [0, 0], sizes = [32, 240], strides = [1, 1]} : vector<32x256xbf16> to vector<32x240xbf16>
    %22 = tpu.concatenate %20, %21 in 1 : vector<32x16xbf16>, vector<32x240xbf16> -> vector<32x256xbf16>
    %cst_19 = arith.constant 0.000000e+00 : bf16
    %23 = vector.broadcast %cst_19 : bf16 to vector<32x15xbf16>
    %24 = vector.extract_strided_slice %13 {offsets = [0, 0], sizes = [32, 241], strides = [1, 1]} : vector<32x256xbf16> to vector<32x241xbf16>
    %25 = tpu.concatenate %23, %24 in 1 : vector<32x15xbf16>, vector<32x241xbf16> -> vector<32x256xbf16>
    %cst_20 = arith.constant 0.000000e+00 : bf16
    %26 = vector.broadcast %cst_20 : bf16 to vector<32x1xbf16>
    %27 = vector.extract_strided_slice %16 {offsets = [0, 0], sizes = [32, 255], strides = [1, 1]} : vector<32x256xbf16> to vector<32x255xbf16>
    %28 = tpu.concatenate %26, %27 in 1 : vector<32x1xbf16>, vector<32x255xbf16> -> vector<32x256xbf16>
    %cst_21 = arith.constant 0.000000e+00 : bf16
    %29 = vector.broadcast %cst_21 : bf16 to vector<32x1xbf16>
    %30 = vector.extract_strided_slice %13 {offsets = [0, 1], sizes = [32, 255], strides = [1, 1]} : vector<32x256xbf16> to vector<32x255xbf16>
    %31 = tpu.concatenate %30, %29 in 1 : vector<32x255xbf16>, vector<32x1xbf16> -> vector<32x256xbf16>
    %cst_22 = arith.constant 0.000000e+00 : bf16
    %32 = vector.broadcast %cst_22 : bf16 to vector<32x15xbf16>
    %33 = vector.extract_strided_slice %16 {offsets = [0, 15], sizes = [32, 241], strides = [1, 1]} : vector<32x256xbf16> to vector<32x241xbf16>
    %34 = tpu.concatenate %33, %32 in 1 : vector<32x241xbf16>, vector<32x15xbf16> -> vector<32x256xbf16>
    %cst_23 = arith.constant 0.000000e+00 : bf16
    %35 = vector.broadcast %cst_23 : bf16 to vector<32x16xbf16>
    %36 = vector.extract_strided_slice %10 {offsets = [0, 16], sizes = [32, 240], strides = [1, 1]} : vector<32x256xbf16> to vector<32x240xbf16>
    %37 = tpu.concatenate %36, %35 in 1 : vector<32x240xbf16>, vector<32x16xbf16> -> vector<32x256xbf16>
    %cst_24 = arith.constant 0.000000e+00 : bf16
    %38 = vector.broadcast %cst_24 : bf16 to vector<32x17xbf16>
    %39 = vector.extract_strided_slice %13 {offsets = [0, 17], sizes = [32, 239], strides = [1, 1]} : vector<32x256xbf16> to vector<32x239xbf16>
    %40 = tpu.concatenate %39, %38 in 1 : vector<32x239xbf16>, vector<32x17xbf16> -> vector<32x256xbf16>
    %41 = tpu.concatenate %19, %22, %25, %28, %10, %31, %34, %37, %40 in 0 : vector<32x256xbf16>, vector<32x256xbf16>, vector<32x256xbf16>, vector<32x256xbf16>, vector<32x256xbf16>, vector<32x256xbf16>, vector<32x256xbf16>, vector<32x256xbf16>, vector<32x256xbf16> -> vector<288x256xbf16>
    %cst_25 = arith.constant dense<0.000000e+00> : vector<32x256xf32>
    %42 = tpu.matmul %0, %41, %cst_25 {dimension_numbers = #tpu.dot_dimension_numbers<[1], [0], [0], [1], [0, 0, 1, 1], [], []>} : vector<32x288xbf16>, vector<288x256xbf16>, vector<32x256xf32> -> vector<32x256xf32>
    %cst_26 = arith.constant dense<0.000000e+00> : vector<32xf32>
    %43 = vector.multi_reduction <add>, %42, %cst_26 [1] : vector<32x256xf32> to vector<32xf32>
    %44 = vector.shape_cast %43 : vector<32xf32> to vector<32x1xf32>
    %45 = arith.mulf %42, %42 : vector<32x256xf32>
    %cst_27 = arith.constant dense<0.000000e+00> : vector<32xf32>
    %46 = vector.multi_reduction <add>, %45, %cst_27 [1] : vector<32x256xf32> to vector<32xf32>
    %47 = vector.shape_cast %46 : vector<32xf32> to vector<32x1xf32>
    %cst_28 = arith.constant 3.906250e-03 : f32
    %48 = vector.broadcast %cst_28 : f32 to vector<32x1xf32>
    %49 = arith.mulf %44, %48 : vector<32x1xf32>
    %cst_29 = arith.constant 3.906250e-03 : f32
    %50 = vector.broadcast %cst_29 : f32 to vector<32x1xf32>
    %51 = arith.mulf %47, %50 : vector<32x1xf32>
    %52 = arith.mulf %49, %49 : vector<32x1xf32>
    %53 = arith.subf %51, %52 : vector<32x1xf32>
    %cst_30 = arith.constant 0.000000e+00 : f32
    %54 = vector.broadcast %cst_30 : f32 to vector<32x1xf32>
    %55 = arith.maximumf %53, %54 : vector<32x1xf32>
    %cst_31 = arith.constant 9.99999974E-6 : f32
    %56 = vector.broadcast %cst_31 : f32 to vector<32x1xf32>
    %57 = arith.addf %55, %56 : vector<32x1xf32>
    %58 = math.rsqrt %57 : vector<32x1xf32>
    %59 = vector.broadcast %49 : vector<32x1xf32> to vector<32x256xf32>
    %60 = arith.subf %42, %59 : vector<32x256xf32>
    %61 = arith.mulf %58, %4 : vector<32x1xf32>
    %62 = vector.broadcast %61 : vector<32x1xf32> to vector<32x256xf32>
    %63 = arith.mulf %60, %62 : vector<32x256xf32>
    %64 = vector.broadcast %5 : vector<32x1xf32> to vector<32x256xf32>
    %65 = arith.addf %63, %64 : vector<32x256xf32>
    %cst_32 = arith.constant 0.000000e+00 : f32
    %66 = vector.broadcast %cst_32 : f32 to vector<32x256xf32>
    %67 = arith.maximumf %65, %66 : vector<32x256xf32>
    %68 = arith.truncf %67 : vector<32x256xf32> to vector<32x256xbf16>
    %69 = vector.broadcast %2 : vector<1x256xf32> to vector<32x256xf32>
    %70 = arith.mulf %67, %69 : vector<32x256xf32>
    %71 = arith.truncf %70 : vector<32x256xf32> to vector<32x256xbf16>
    %72 = vector.broadcast %3 : vector<1x256xf32> to vector<32x256xf32>
    %73 = arith.mulf %67, %72 : vector<32x256xf32>
    %74 = arith.truncf %73 : vector<32x256xf32> to vector<32x256xbf16>
    %cst_33 = arith.constant 0.000000e+00 : bf16
    %75 = vector.broadcast %cst_33 : bf16 to vector<32x17xbf16>
    %76 = vector.extract_strided_slice %74 {offsets = [0, 0], sizes = [32, 239], strides = [1, 1]} : vector<32x256xbf16> to vector<32x239xbf16>
    %77 = tpu.concatenate %75, %76 in 1 : vector<32x17xbf16>, vector<32x239xbf16> -> vector<32x256xbf16>
    %cst_34 = arith.constant 0.000000e+00 : bf16
    %78 = vector.broadcast %cst_34 : bf16 to vector<32x16xbf16>
    %79 = vector.extract_strided_slice %68 {offsets = [0, 0], sizes = [32, 240], strides = [1, 1]} : vector<32x256xbf16> to vector<32x240xbf16>
    %80 = tpu.concatenate %78, %79 in 1 : vector<32x16xbf16>, vector<32x240xbf16> -> vector<32x256xbf16>
    %cst_35 = arith.constant 0.000000e+00 : bf16
    %81 = vector.broadcast %cst_35 : bf16 to vector<32x15xbf16>
    %82 = vector.extract_strided_slice %71 {offsets = [0, 0], sizes = [32, 241], strides = [1, 1]} : vector<32x256xbf16> to vector<32x241xbf16>
    %83 = tpu.concatenate %81, %82 in 1 : vector<32x15xbf16>, vector<32x241xbf16> -> vector<32x256xbf16>
    %cst_36 = arith.constant 0.000000e+00 : bf16
    %84 = vector.broadcast %cst_36 : bf16 to vector<32x1xbf16>
    %85 = vector.extract_strided_slice %74 {offsets = [0, 0], sizes = [32, 255], strides = [1, 1]} : vector<32x256xbf16> to vector<32x255xbf16>
    %86 = tpu.concatenate %84, %85 in 1 : vector<32x1xbf16>, vector<32x255xbf16> -> vector<32x256xbf16>
    %cst_37 = arith.constant 0.000000e+00 : bf16
    %87 = vector.broadcast %cst_37 : bf16 to vector<32x1xbf16>
    %88 = vector.extract_strided_slice %71 {offsets = [0, 1], sizes = [32, 255], strides = [1, 1]} : vector<32x256xbf16> to vector<32x255xbf16>
    %89 = tpu.concatenate %88, %87 in 1 : vector<32x255xbf16>, vector<32x1xbf16> -> vector<32x256xbf16>
    %cst_38 = arith.constant 0.000000e+00 : bf16
    %90 = vector.broadcast %cst_38 : bf16 to vector<32x15xbf16>
    %91 = vector.extract_strided_slice %74 {offsets = [0, 15], sizes = [32, 241], strides = [1, 1]} : vector<32x256xbf16> to vector<32x241xbf16>
    %92 = tpu.concatenate %91, %90 in 1 : vector<32x241xbf16>, vector<32x15xbf16> -> vector<32x256xbf16>
    %cst_39 = arith.constant 0.000000e+00 : bf16
    %93 = vector.broadcast %cst_39 : bf16 to vector<32x16xbf16>
    %94 = vector.extract_strided_slice %68 {offsets = [0, 16], sizes = [32, 240], strides = [1, 1]} : vector<32x256xbf16> to vector<32x240xbf16>
    %95 = tpu.concatenate %94, %93 in 1 : vector<32x240xbf16>, vector<32x16xbf16> -> vector<32x256xbf16>
    %cst_40 = arith.constant 0.000000e+00 : bf16
    %96 = vector.broadcast %cst_40 : bf16 to vector<32x17xbf16>
    %97 = vector.extract_strided_slice %71 {offsets = [0, 17], sizes = [32, 239], strides = [1, 1]} : vector<32x256xbf16> to vector<32x239xbf16>
    %98 = tpu.concatenate %97, %96 in 1 : vector<32x239xbf16>, vector<32x17xbf16> -> vector<32x256xbf16>
    %99 = tpu.concatenate %77, %80, %83, %86, %68, %89, %92, %95, %98 in 0 : vector<32x256xbf16>, vector<32x256xbf16>, vector<32x256xbf16>, vector<32x256xbf16>, vector<32x256xbf16>, vector<32x256xbf16>, vector<32x256xbf16>, vector<32x256xbf16>, vector<32x256xbf16> -> vector<288x256xbf16>
    %cst_41 = arith.constant dense<0.000000e+00> : vector<32x256xf32>
    %100 = tpu.matmul %1, %99, %cst_41 {dimension_numbers = #tpu.dot_dimension_numbers<[1], [0], [0], [1], [0, 0, 1, 1], [], []>} : vector<32x288xbf16>, vector<288x256xbf16>, vector<32x256xf32> -> vector<32x256xf32>
    %cst_42 = arith.constant dense<0.000000e+00> : vector<32xf32>
    %101 = vector.multi_reduction <add>, %100, %cst_42 [1] : vector<32x256xf32> to vector<32xf32>
    %102 = vector.shape_cast %101 : vector<32xf32> to vector<32x1xf32>
    %103 = arith.mulf %100, %100 : vector<32x256xf32>
    %cst_43 = arith.constant dense<0.000000e+00> : vector<32xf32>
    %104 = vector.multi_reduction <add>, %103, %cst_43 [1] : vector<32x256xf32> to vector<32xf32>
    %105 = vector.shape_cast %104 : vector<32xf32> to vector<32x1xf32>
    %cst_44 = arith.constant 3.906250e-03 : f32
    %106 = vector.broadcast %cst_44 : f32 to vector<32x1xf32>
    %107 = arith.mulf %102, %106 : vector<32x1xf32>
    %cst_45 = arith.constant 3.906250e-03 : f32
    %108 = vector.broadcast %cst_45 : f32 to vector<32x1xf32>
    %109 = arith.mulf %105, %108 : vector<32x1xf32>
    %110 = arith.mulf %107, %107 : vector<32x1xf32>
    %111 = arith.subf %109, %110 : vector<32x1xf32>
    %cst_46 = arith.constant 0.000000e+00 : f32
    %112 = vector.broadcast %cst_46 : f32 to vector<32x1xf32>
    %113 = arith.maximumf %111, %112 : vector<32x1xf32>
    %cst_47 = arith.constant 9.99999974E-6 : f32
    %114 = vector.broadcast %cst_47 : f32 to vector<32x1xf32>
    %115 = arith.addf %113, %114 : vector<32x1xf32>
    %116 = math.rsqrt %115 : vector<32x1xf32>
    %117 = vector.broadcast %107 : vector<32x1xf32> to vector<32x256xf32>
    %118 = arith.subf %100, %117 : vector<32x256xf32>
    %119 = arith.mulf %116, %6 : vector<32x1xf32>
    %120 = vector.broadcast %119 : vector<32x1xf32> to vector<32x256xf32>
    %121 = arith.mulf %118, %120 : vector<32x256xf32>
    %122 = vector.broadcast %7 : vector<32x1xf32> to vector<32x256xf32>
    %123 = arith.addf %121, %122 : vector<32x256xf32>
    %124 = arith.addf %123, %9 : vector<32x256xf32>
    %cst_48 = arith.constant 0.000000e+00 : f32
    %125 = vector.broadcast %cst_48 : f32 to vector<32x256xf32>
    %126 = arith.maximumf %124, %125 : vector<32x256xf32>
    %c0_49 = arith.constant 0 : index
    %c0_50 = arith.constant 0 : index
    %c0_51 = arith.constant 0 : index
    %127 = vector.load %arg11[%c0_49, %c0_50, %c0_51] : memref<1x32x256xf32, #tpu.memory_space<vmem>>, vector<1x32x256xf32>
    %128 = vector.shape_cast %127 : vector<1x32x256xf32> to vector<32x256xf32>
    %129 = vector.shape_cast %126 : vector<32x256xf32> to vector<1x32x256xf32>
    tpu.vector_store %arg11[%c0_49, %c0_50, %c0_51], %129 {strides = array<i32>} : memref<1x32x256xf32, #tpu.memory_space<vmem>>, vector<1x32x256xf32>,
    return
  }
  func.func @transform_0(%arg0: i32) -> (i32, i32, i32) {
    %c0_i32 = arith.constant 0 : i32
    %c0_i32_0 = arith.constant 0 : i32
    %c0_i32_1 = arith.constant 0 : i32
    return %arg0, %c0_i32, %c0_i32_0 : i32, i32, i32
  }
  func.func @transform_1(%arg0: i32) -> (i32, i32) {
    %c0_i32 = arith.constant 0 : i32
    %c0_i32_0 = arith.constant 0 : i32
    %c0_i32_1 = arith.constant 0 : i32
    return %c0_i32, %c0_i32_0 : i32, i32
  }
  func.func @transform_2(%arg0: i32) -> (i32, i32) {
    %c0_i32 = arith.constant 0 : i32
    %c0_i32_0 = arith.constant 0 : i32
    %c0_i32_1 = arith.constant 0 : i32
    return %c0_i32, %c0_i32_0 : i32, i32
  }
  func.func @transform_3(%arg0: i32) -> (i32, i32) {
    %c0_i32 = arith.constant 0 : i32
    %c0_i32_0 = arith.constant 0 : i32
    %c0_i32_1 = arith.constant 0 : i32
    return %c0_i32, %c0_i32_0 : i32, i32
  }
  func.func @transform_4(%arg0: i32) -> (i32, i32) {
    %c0_i32 = arith.constant 0 : i32
    %c0_i32_0 = arith.constant 0 : i32
    %c0_i32_1 = arith.constant 0 : i32
    return %c0_i32, %c0_i32_0 : i32, i32
  }
  func.func @transform_5(%arg0: i32) -> (i32, i32) {
    %c0_i32 = arith.constant 0 : i32
    %c0_i32_0 = arith.constant 0 : i32
    %c0_i32_1 = arith.constant 0 : i32
    return %c0_i32, %c0_i32_0 : i32, i32
  }
  func.func @transform_6(%arg0: i32) -> (i32, i32) {
    %c0_i32 = arith.constant 0 : i32
    %c0_i32_0 = arith.constant 0 : i32
    %c0_i32_1 = arith.constant 0 : i32
    return %c0_i32, %c0_i32_0 : i32, i32
  }
  func.func @transform_7(%arg0: i32) -> (i32, i32) {
    %c0_i32 = arith.constant 0 : i32
    %c0_i32_0 = arith.constant 0 : i32
    %c0_i32_1 = arith.constant 0 : i32
    return %c0_i32, %c0_i32_0 : i32, i32
  }
  func.func @transform_8(%arg0: i32) -> (i32, i32) {
    %c0_i32 = arith.constant 0 : i32
    %c0_i32_0 = arith.constant 0 : i32
    %c0_i32_1 = arith.constant 0 : i32
    return %c0_i32, %c0_i32_0 : i32, i32
  }
  func.func @transform_9(%arg0: i32) -> (i32, i32) {
    %c0_i32 = arith.constant 0 : i32
    %c0_i32_0 = arith.constant 0 : i32
    %c0_i32_1 = arith.constant 0 : i32
    return %c0_i32, %c0_i32_0 : i32, i32
  }
  func.func @transform_10(%arg0: i32) -> (i32, i32, i32) {
    %c0_i32 = arith.constant 0 : i32
    %c0_i32_0 = arith.constant 0 : i32
    %c0_i32_1 = arith.constant 0 : i32
    return %arg0, %c0_i32, %c0_i32_0 : i32, i32, i32
  }
}

</mosaic_0001>

<bundles_post_ra>
// kernel: basic_block_forward.1
= control target key start
LH: loop header
LB: loop body
LE: loop exit
PB: predicated region body
PF: predicated region fallthrough
CT: control target
= control target key end

     0   :  { %s1662_s13 = smov 0   ;;  %s2244_s0 = inlined_call_operand.vmem [shape: f32[2,32,256], index: 0, kind: input, shape index: {}]   ;;  %s2245_s1 = inlined_call_operand.vmem [shape: bf16[32,288], index: 1, kind: input, shape index: {}]   ;;  %s2246_s2 = inlined_call_operand.vmem [shape: bf16[32,288], index: 2, kind: input, shape index: {}]   ;;  %s2247_s3 = inlined_call_operand.vmem [shape: f32[32,1], index: 3, kind: input, shape index: {}]   ;;  %s2248_s4 = inlined_call_operand.vmem [shape: f32[32,1], index: 4, kind: input, shape index: {}]   ;;  %s2249_s5 = inlined_call_operand.vmem [shape: f32[32,1], index: 5, kind: input, shape index: {}]   ;;  %s2250_s6 = inlined_call_operand.vmem [shape: f32[32,1], index: 6, kind: input, shape index: {}]   ;;  %s2251_s7 = inlined_call_operand.vmem [shape: f32[32,32], index: 7, kind: input, shape index: {}]   ;;  %s2252_s8 = inlined_call_operand.vmem [shape: f32[1,256], index: 8, kind: input, shape index: {}]   ;;  %s2253_s9 = inlined_call_operand.vmem [shape: f32[1,256], index: 9, kind: input, shape index: {}]   ;;  %s2254_s10 = inlined_call_operand.vmem [shape: f32[2,32,256], index: 10, kind: output, shape index: {}]  }
   0x1 LB: > { %s1438_s7 = sadd.s32 4294967295, %s1596_s13   ;;  %p1442_p0 = scmp.ge.s32.totalorder %s1596_s13, 1  ;;  %s1596_s13 = sphi %s1662_s13, %s20_s13  }
   0x2   : > { %p312_p1 = scmp.lt.s32.totalorder %s1596_s13, 3 }
   0x4   : > { %p313_p2 = pnand %p1442_p0, %p312_p1 }
   0x5   : > { %p350_p3 = scmp.lt.s32.totalorder (!%p313_p2), %s1438_s7, 1  ;;  %v408_v0 = vlaneseq (!%p313_p2)  ;;  %v378_v2 = vld [vmem:[%s2253_s9] sm:$0x3] (!%p313_p2)  ;;  %s1598_s20 = smov (!%p313_p2), 17   ;;  %v1552_v46 = vld [vmem:[%s2245_s1 + $0x4] ss:$12 sps:$4 sm:$0xff] (!%p313_p2)  }
   0x6   : > { %316 = sbr.rel (%p313_p2) target bundleno = 1489 (0x5d1), region = 60  ;;  %v377_v27 = vld [vmem:[%s2252_s8] sm:$0x3] (!%p313_p2)  ;;  %s1599_s23 = smov (!%p313_p2), 16   ;;  %695 = vmatprep.mubr.bf16.mxu0 (!%p313_p2), %v1552_v46  ;;  %v1606_v47 = vmov (!%p313_p2), 0   ;;  %vm465_vm0 = vcmask (!%p313_p2), 138240  }
   0x7   : > { %v409_v1 = vshrl.u32 (!%p313_p2), %v408_v0, 7  ;;  %s1600_s24 = smov (!%p313_p2), 15   ;;  %s1601_s25 = smov (!%p313_p2), 1   ;;  %1548 = vset.pattern.permute.xlu1 (!%p313_p2), %v1606_v47  ;;  %1549 = vset.pattern.permute.xlu0 (!%p313_p2), %v1606_v47  ;;  %vm1772_vm1 = vmneg (!%p313_p2), %vm465_vm0  ;;  %vm490_vm2 = vcmask (!%p313_p2), 130048   ;;  %vm514_vm4 = vcmask (!%p313_p2), 121856   ;;  %vm534_vm6 = vcmask (!%p313_p2), 7168  }
   0x8   : > { %s1602_s26 = smov (!%p313_p2), 127   ;;  %s1603_s27 = smov (!%p313_p2), 113   ;;  %vm1784_vm3 = vmneg (!%p313_p2), %vm490_vm2  ;;  %vm554_vm8 = vcmask (!%p313_p2), 1039360   ;;  %vm574_vm9 = vcmask (!%p313_p2), 924672   ;;  %vm594_vm10 = vcmask (!%p313_p2), 916480   ;;  %vm614_vm11 = vcmask (!%p313_p2), 908288  }
   0x9   : > { %v410_v3 = vsub.s32 (!%p313_p2), 0, %v409_v1  ;;  %v414_v4 = vsub.s32 (!%p313_p2), 1, %v409_v1  ;;  %s1604_s28 = smov (!%p313_p2), 112   ;;  %s1605_s11 = smov (!%p313_p2), 111   ;;  %vm1795_vm5 = vmneg (!%p313_p2), %vm514_vm4  ;;  %vm656_vm12 = vcmask (!%p313_p2), 261120  }
   0xa   : > { %vm1806_vm7 = vmneg (!%p313_p2), %vm534_vm6 }
   0xb   : > { %v1685_v7 = vrot.slane (!%p313_p2), %v378_v2, %v410_v3  ;;  %v1688_v9 = vrot.slane (!%p313_p2), %v378_v2, %v414_v4  ;;  %v1708_v28 = vrot.slane (!%p313_p2), %v377_v27, %v414_v4  ;;  %v1716_v31 = vrot.slane (!%p313_p2), %v377_v27, %v410_v3 }
   0xd   : > { %s2264_s7 = smov (!%p350_p3, %s1438_s7), 1 }
   0xe   : > { %s1513_s16 = sshll.u32 %s2264_s7, 6 }
   0xf   : > { %s1681_s19 = scalar_lea.vmem %s2244_s0, %s1513_s16  ;;  %s2213_s18 = scalar_lea.vmem %s2254_s10, %s1513_s16 }
  0x10   : > { %v399_v5 = vld [vmem:[%s1681_s19 + $0x20] sm:$0xff]  ;;  %v401_v6 = vld [vmem:[%s1681_s19 + $0x30] sm:$0xff]  ;;  %v400_v11 = vld [vmem:[%s1681_s19 + $0x28] sm:$0xff] }
  0x11   : > { %v395_v8 = vld [vmem:[%s1681_s19] sm:$0xff]  ;;  %v397_v10 = vld [vmem:[%s1681_s19 + $0x10] sm:$0xff]  ;;  %v402_v12 = vld [vmem:[%s1681_s19 + $0x38] sm:$0xff]  ;;  %v445_v13 = vmul.f32 %v1685_v7, %v399_v5  ;;  %v447_v14 = vmul.f32 %v1685_v7, %v401_v6  ;;  %v446_v19 = vmul.f32 %v1688_v9, %v400_v11  ;;  %v1720_v33 = vpack.c.bf16 %v401_v6, %v399_v5 }
  0x12   : > { %v441_v15 = vmul.f32 %v1685_v7, %v395_v8  ;;  %v443_v16 = vmul.f32 %v1685_v7, %v397_v10  ;;  %v396_v17 = vld [vmem:[%s1681_s19 + $0x8] sm:$0xff]  ;;  %v398_v18 = vld [vmem:[%s1681_s19 + $0x18] sm:$0xff]  ;;  %v448_v20 = vmul.f32 %v1688_v9, %v402_v12  ;;  %v1714_v30 = vpack.c.bf16 %v397_v10, %v395_v8 }
  0x13   : > { %v442_v21 = vmul.f32 %v1688_v9, %v396_v17  ;;  %v444_v22 = vmul.f32 %v1688_v9, %v398_v18  ;;  %v451_v23 = vpack.c.bf16 %v447_v14, %v445_v13  ;;  %v1712_v29 = vpack.c.bf16 %v398_v18, %v396_v17 }
  0x14   : > { %v449_v24 = vpack.c.bf16 %v443_v16, %v441_v15  ;;  %v452_v25 = vpack.c.bf16 %v448_v20, %v446_v19  ;;  %v1718_v32 = vpack.c.bf16 %v402_v12, %v400_v11  ;;  %v419_v34 = vmul.f32 %v1708_v28, %v396_v17 }
  0x15   : > { %461 = vrot.lane.b32.xlu1 %v451_v23, %s1598_s20  ;;  %v450_v26 = vpack.c.bf16 %v444_v22, %v442_v21  ;;  %v421_v35 = vmul.f32 %v1708_v28, %v398_v18  ;;  %v418_v36 = vmul.f32 %v1716_v31, %v395_v8  ;;  %v420_v37 = vmul.f32 %v1716_v31, %v397_v10 }
  0x16   : > { %457 = vrot.lane.b32.xlu0 %v449_v24, %s1598_s20  ;;  %v423_v38 = vmul.f32 %v1708_v28, %v400_v11  ;;  %v425_v39 = vmul.f32 %v1708_v28, %v402_v12  ;;  %v422_v40 = vmul.f32 %v1716_v31, %v399_v5  ;;  %v424_v43 = vmul.f32 %v1716_v31, %v401_v6 }
  0x17   : > { %v427_v41 = vpack.c.bf16 %v421_v35, %v419_v34  ;;  %v426_v42 = vpack.c.bf16 %v420_v37, %v418_v36  ;;  %v1550_v36 = vld [vmem:[%s2245_s1] ss:$12 sps:$4 sm:$0xff]   ;;  %v1553_v37 = vld [vmem:[%s2245_s1 + $0x1c] ss:$12 sps:$4 sm:$0xff]  }
  0x18   : > { %v429_v44 = vpack.c.bf16 %v425_v39, %v423_v38  ;;  %v428_v45 = vpack.c.bf16 %v424_v43, %v422_v40  ;;  %v1556_v43 = vld [vmem:[%s2245_s1 + $0x8] ss:$12 sps:$4 sm:$0xff]  }
  0x19   : > { %463 = vrot.lane.b32.xlu1 %v452_v25, %s1598_s20 }
  0x1a   : > { %459 = vrot.lane.b32.xlu0 %v450_v26, %s1598_s20 }
  0x1d   : > { %484 = vrot.lane.b32.xlu1 %v1712_v29, %s1599_s23 }
  0x1e   : > { %482 = vrot.lane.b32.xlu0 %v1714_v30, %s1599_s23 }
  0x21   : > { %488 = vrot.lane.b32.xlu1 %v1718_v32, %s1599_s23 }
  0x22   : > { %486 = vrot.lane.b32.xlu0 %v1720_v33, %s1599_s23 }
  0x25   : > { %508 = vrot.lane.b32.xlu1 %v427_v41, %s1600_s24 }
  0x26   : > { %506 = vrot.lane.b32.xlu0 %v426_v42, %s1600_s24 }
  0x29   : > { %512 = vrot.lane.b32.xlu1 %v429_v44, %s1600_s24 }
  0x2a   : > { %510 = vrot.lane.b32.xlu0 %v428_v45, %s1600_s24 }
  0x2d   : > { %528 = vrot.lane.b32.xlu1 %v450_v26, %s1601_s25 }
  0x2e   : > { %526 = vrot.lane.b32.xlu0 %v449_v24, %s1601_s25 }
  0x31   : > { %532 = vrot.lane.b32.xlu1 %v452_v25, %s1601_s25 }
  0x32   : > { %530 = vrot.lane.b32.xlu0 %v451_v23, %s1601_s25 }
  0x35   : > { %548 = vrot.lane.b32.xlu1 %v427_v41, %s1602_s26 }
  0x36   : > { %546 = vrot.lane.b32.xlu0 %v426_v42, %s1602_s26 }
  0x39   : > { %552 = vrot.lane.b32.xlu1 %v429_v44, %s1602_s26 }
  0x3a   : > { %550 = vrot.lane.b32.xlu0 %v428_v45, %s1602_s26 }
  0x3d   : > { %568 = vrot.lane.b32.xlu1 %v450_v26, %s1603_s27 }
  0x3e   : > { %566 = vrot.lane.b32.xlu0 %v449_v24, %s1603_s27 }
  0x41   : > { %572 = vrot.lane.b32.xlu1 %v452_v25, %s1603_s27 }
  0x42   : > { %570 = vrot.lane.b32.xlu0 %v451_v23, %s1603_s27 }
  0x45   : > { %588 = vrot.lane.b32.xlu1 %v1712_v29, %s1604_s28 }
  0x46   : > { %586 = vrot.lane.b32.xlu0 %v1714_v30, %s1604_s28 }
  0x49   : > { %592 = vrot.lane.b32.xlu1 %v1718_v32, %s1604_s28 }
  0x4a   : > { %590 = vrot.lane.b32.xlu0 %v1720_v33, %s1604_s28 }
  0x4d   : > { %608 = vrot.lane.b32.xlu1 %v427_v41, %s1605_s11 }
  0x4e   : > { %606 = vrot.lane.b32.xlu0 %v426_v42, %s1605_s11  ;;  %v1555_v42 = vld [vmem:[%s2245_s1 + $0x18] ss:$12 sps:$4 sm:$0xff]  }
  0x51   : > { %612 = vrot.lane.b32.xlu1 %v429_v44, %s1605_s11  ;;  %v1557_v44 = vld [vmem:[%s2245_s1 + $0x20] ss:$12 sps:$4 sm:$0xff]  }
  0x52   : > { %610 = vrot.lane.b32.xlu0 %v428_v45, %s1605_s11 }
  0x87   : > { %v462_v48 = vpop.permute.xlu1 %461 }
  0x88   : > { %v458_v49 = vpop.permute.xlu0 %457 }
  0x8b   : > { %v464_v50 = vpop.permute.xlu1 %463 }
  0x8c   : > { %v460_v51 = vpop.permute.xlu0 %459  ;;  %v467_v54 = vsel %vm465_vm0, %v462_v48, %v464_v50 }
  0x8d   : > { %v466_v53 = vsel %vm465_vm0, %v458_v49, %v460_v51 }
  0x8e   : > { %663 = vmatprep.subr.bf16.mxu0 %v466_v53 }
  0x8f   : > { %1454 = vmatpush1.bf16.msk.msra.mxu0 %vm1772_vm1, %v458_v49  ;;  %v485_v55 = vpop.permute.xlu1 %484 }
  0x90   : > { %665 = vmatprep.subr.bf16.mxu0 %v467_v54  ;;  %v483_v56 = vpop.permute.xlu0 %482 }
  0x91   : > { %v491_v57 = vsel %vm490_vm2, %v483_v56, %v485_v55 }
  0x93   : > { %1456 = vmatpush1.bf16.msk.msra.mxu0 %vm1772_vm1, %v462_v48  ;;  %v489_v59 = vpop.permute.xlu1 %488 }
  0x94   : > { %667 = vmatprep.subr.bf16.mxu0 %v491_v57  ;;  %v487_v60 = vpop.permute.xlu0 %486 }
  0x95   : > { %v492_v61 = vsel %vm490_vm2, %v487_v60, %v489_v59 }
  0x97   : > { %1458 = vmatpush1.bf16.msk.msra.mxu0 %vm1784_vm3, %v483_v56  ;;  %v509_v62 = vpop.permute.xlu1 %508 }
  0x98   : > { %669 = vmatprep.subr.bf16.mxu0 %v492_v61  ;;  %v507_v63 = vpop.permute.xlu0 %506 }
  0x99   : > { %v515_v0 = vsel %vm514_vm4, %v507_v63, %v509_v62 }
  0x9b   : > { %1460 = vmatpush1.bf16.msk.msra.mxu0 %vm1784_vm3, %v487_v60  ;;  %v513_v2 = vpop.permute.xlu1 %512 }
  0x9c   : > { %671 = vmatprep.subr.bf16.mxu0 %v515_v0  ;;  %v511_v3 = vpop.permute.xlu0 %510 }
  0x9d   : > { %v516_v4 = vsel %vm514_vm4, %v511_v3, %v513_v2 }
  0x9f   : > { %1462 = vmatpush1.bf16.msk.msra.mxu0 %vm1795_vm5, %v507_v63  ;;  %v529_v5 = vpop.permute.xlu1 %528 }
  0xa0   : > { %673 = vmatprep.subr.bf16.mxu0 %v516_v4  ;;  %v527_v6 = vpop.permute.xlu0 %526 }
  0xa1   : > { %v535_v8 = vsel %vm534_vm6, %v527_v6, %v529_v5 }
  0xa3   : > { %1464 = vmatpush1.bf16.msk.msra.mxu0 %vm1795_vm5, %v511_v3  ;;  %v533_v11 = vpop.permute.xlu1 %532 }
  0xa4   : > { %675 = vmatprep.subr.bf16.mxu0 %v535_v8  ;;  %v531_v12 = vpop.permute.xlu0 %530 }
  0xa5   : > { %v536_v13 = vsel %vm534_vm6, %v531_v12, %v533_v11 }
  0xa7   : > { %1466 = vmatpush1.bf16.msk.msra.mxu0 %vm1806_vm7, %v527_v6  ;;  %v549_v14 = vpop.permute.xlu1 %548 }
  0xa8   : > { %677 = vmatprep.subr.bf16.mxu0 %v536_v13  ;;  %v547_v15 = vpop.permute.xlu0 %546 }
  0xa9   : > { %v555_v20 = vsel %vm554_vm8, %v547_v15, %v549_v14 }
  0xab   : > { %1468 = vmatpush1.bf16.msk.msra.mxu0 %vm1806_vm7, %v531_v12  ;;  %v553_v16 = vpop.permute.xlu1 %552 }
  0xac   : > { %679 = vmatprep.subr.bf16.mxu0 %v1712_v29  ;;  %v551_v17 = vpop.permute.xlu0 %550 }
  0xad   : > { %v556_v23 = vsel %vm554_vm8, %v551_v17, %v553_v16 }
  0xaf   : > { %680 = vmatpush1.bf16.msra.mxu0 %v1714_v30  ;;  %v569_v18 = vpop.permute.xlu1 %568 }
  0xb0   : > { %681 = vmatprep.subr.bf16.mxu0 %v1718_v32  ;;  %v567_v19 = vpop.permute.xlu0 %566 }
  0xb1   : > { %v575_v24 = vsel %vm574_vm9, %v567_v19, %v569_v18 }
  0xb3   : > { %682 = vmatpush1.bf16.msra.mxu0 %v1720_v33  ;;  %v573_v21 = vpop.permute.xlu1 %572 }
  0xb4   : > { %1469 = vmatprep.subr.msk.bf16.mxu0 %vm554_vm8, %v549_v14  ;;  %v571_v22 = vpop.permute.xlu0 %570 }
  0xb5   : > { %v576_v27 = vsel %vm574_vm9, %v571_v22, %v573_v21 }
  0xb7   : > { %684 = vmatpush1.bf16.msra.mxu0 %v555_v20  ;;  %v589_v25 = vpop.permute.xlu1 %588 }
  0xb8   : > { %1470 = vmatprep.subr.msk.bf16.mxu0 %vm554_vm8, %v553_v16  ;;  %v587_v26 = vpop.permute.xlu0 %586 }
  0xb9   : > { %v595_v32 = vsel %vm594_vm10, %v587_v26, %v589_v25 }
  0xbb   : > { %686 = vmatpush1.bf16.msra.mxu0 %v556_v23  ;;  %v593_v29 = vpop.permute.xlu1 %592 }
  0xbc   : > { %1471 = vmatprep.subr.msk.bf16.mxu0 %vm574_vm9, %v569_v18  ;;  %v591_v30 = vpop.permute.xlu0 %590 }
  0xbd   : > { %v596_v35 = vsel %vm594_vm10, %v591_v30, %v593_v29 }
  0xbf   : > { %688 = vmatpush1.bf16.msra.mxu0 %v575_v24  ;;  %v609_v33 = vpop.permute.xlu1 %608 }
  0xc0   : > { %1472 = vmatprep.subr.msk.bf16.mxu0 %vm574_vm9, %v573_v21  ;;  %v607_v34 = vpop.permute.xlu0 %606 }
  0xc1   : > { %v615_v38 = vsel %vm614_vm11, %v607_v34, %v609_v33 }
  0xc3   : > { %690 = vmatpush1.bf16.msra.mxu0 %v576_v27  ;;  %v613_v39 = vpop.permute.xlu1 %612 }
  0xc4   : > { %1473 = vmatprep.subr.msk.bf16.mxu0 %vm594_vm10, %v589_v25  ;;  %v611_v40 = vpop.permute.xlu0 %610 }
  0xc5   : > { %v616_v41 = vsel %vm614_vm11, %v611_v40, %v613_v39 }
  0xc7   : > { %692 = vmatpush1.bf16.msra.mxu0 %v595_v32 }
  0xc8   : > { %1474 = vmatprep.subr.msk.bf16.mxu0 %vm594_vm10, %v593_v29 }
  0xcb   : > { %694 = vmatpush1.bf16.msra.mxu0 %v596_v35 }
  0xcc   : > { %1475 = vmatprep.subr.msk.bf16.mxu0 %vm614_vm11, %v609_v33 }
  0xce   : > { %696 = vmatmul.mubr.bf16.vlgmr.msra.gmra.mrb[0].mxu0 %v1550_v36 }
  0xcf   : > { %717 = vmatpush1.bf16.msra.mxu0 %v615_v38  ;;  %705 = vmatprep.mubr.bf16.mxu0 %v1553_v37 }
  0xd0   : > { %1476 = vmatprep.subr.msk.bf16.mxu0 %vm614_vm11, %v613_v39 }
  0xd3   : > { %719 = vmatpush1.bf16.msra.mxu0 %v616_v41 }
  0xd6   : > { %706 = vmatmul.mubr.bf16.gmra.mrb[4].mxu0 %v1555_v42 }
  0xd7   : > { %748 = vmatprep.mubr.bf16.mxu0 %v1606_v47 }
  0xde   : > { %1477 = vmatmul.mubr.msk.bf16.vlgmr.msra.gmra.mrb[0].mxu0 %vm656_vm12, %v1556_v43 }
  0xdf   : > { %758 = vmatprep.mubr.bf16.mxu0 %v1606_v47 }
  0xe6   : > { %1478 = vmatmul.mubr.msk.bf16.gmra.mrb[4].mxu0 %vm656_vm12, %v1557_v44 }
 0x1b1   : > { %v1854_v45 = vpop.f32.mrb[0].mxu0 }
 0x1b2   : > { %v1856_v46 = vpop.f32.mrb[1].mxu0  ;;  %v781_v48 = vmul.f32 %v1854_v45, %v1854_v45 }
 0x1b3   : > { %v1860_v49 = vpop.f32.mrb[2].mxu0  ;;  %v769_v50 = vadd.f32 %v1856_v46, %v1854_v45  ;;  %v782_v51 = vmul.f32 %v1856_v46, %v1856_v46 }
 0x1b4   : > { %v1866_v53 = vpop.f32.mrb[3].mxu0  ;;  %v783_v54 = vmul.f32 %v1860_v49, %v1860_v49 }
 0x1b5   : > { %770 = vadd.xlane.f32.xlu0 %v769_v50  ;;  %v772_v55 = vadd.f32 %v1866_v53, %v1860_v49  ;;  %v789_v56 = vadd.f32 %v782_v51, %v781_v48  ;;  %v784_v57 = vmul.f32 %v1866_v53, %v1866_v53 }
 0x1b7   : > { %773 = vadd.xlane.f32.xlu1 %v772_v55  ;;  %v792_v59 = vadd.f32 %v784_v57, %v783_v54  ;;  %v379_v57 = vld [vmem:[%s2247_s3] sm:$0xff] }
 0x1b9   : > { %790 = vadd.xlane.f32.xlu0 %v789_v56  ;;  %v1874_v60 = vpop.f32.mrb[4].mxu0 }
 0x1ba   : > { %v1876_v61 = vpop.f32.mrb[5].mxu0  ;;  %v785_v62 = vmul.f32 %v1874_v60, %v1874_v60 }
 0x1bb   : > { %v1880_v63 = vpop.f32.mrb[6].mxu0  ;;  %v775_v0 = vadd.f32 %v1876_v61, %v1874_v60  ;;  %v786_v2 = vmul.f32 %v1876_v61, %v1876_v61 }
 0x1bc   : > { %v1886_v3 = vpop.f32.mrb[7].mxu0  ;;  %v787_v4 = vmul.f32 %v1880_v63, %v1880_v63 }
 0x1bd   : > { %v788_v5 = vmul.f32 %v1886_v3, %v1886_v3  ;;  %793 = vadd.xlane.f32.xlu0 %v792_v59  ;;  %776 = vadd.xlane.f32.xlu1 %v775_v0  ;;  %v795_v6 = vadd.f32 %v786_v2, %v785_v62  ;;  %v778_v8 = vadd.f32 %v1886_v3, %v1880_v63 }
 0x1bf   : > { %v798_v11 = vadd.f32 %v788_v5, %v787_v4  ;;  %v380_v4 = vld [vmem:[%s2247_s3 + $0x8] sm:$0xff] }
 0x1c1   : > { %796 = vadd.xlane.f32.xlu1 %v795_v6  ;;  %779 = vadd.xlane.f32.xlu0 %v778_v8  ;;  %v383_v8 = vld [vmem:[%s2248_s4] sm:$0xff] }
 0x1c5   : > { %799 = vadd.xlane.f32.xlu0 %v798_v11 }
 0x242   : > { %v771_v12 = vpop.xlane.xlu0 %770 }
 0x243   : > { %v1894_v13 = vmul.f32 0.00390625, %v771_v12  ;;  %v384_v12 = vld [vmem:[%s2248_s4 + $0x8] sm:$0xff] }
 0x244   : > { %v774_v14 = vpop.xlane.xlu1 %773 }
 0x245   : > { %v1896_v15 = vmul.f32 0.00390625, %v774_v14  ;;  %v829_v16 = vsub.f32 %v1854_v45, %v1894_v13  ;;  %v830_v17 = vsub.f32 %v1856_v46, %v1894_v13  ;;  %v809_v19 = vmul.f32 %v1894_v13, %v1894_v13  ;;  %v385_v14 = vld [vmem:[%s2248_s4 + $0x10] sm:$0xff] }
 0x246   : > { %v791_v18 = vpop.xlane.xlu0 %790 }
 0x247   : > { %v805_v20 = vmul.f32 0.00390625, %v791_v18  ;;  %v831_v21 = vsub.f32 %v1860_v49, %v1896_v15  ;;  %v832_v22 = vsub.f32 %v1866_v53, %v1896_v15  ;;  %v810_v29 = vmul.f32 %v1896_v15, %v1896_v15 }
 0x249   : > { %v813_v23 = vsub.f32 %v805_v20, %v809_v19  ;;  %v381_v19 = vld [vmem:[%s2247_s3 + $0x10] sm:$0xff] }
 0x24a   : > { %v794_v24 = vpop.xlane.xlu0 %793  ;;  %v777_v25 = vpop.xlane.xlu1 %776 }
 0x24b   : > { %v817_v26 = vmax.f32 %v813_v23, 0.0  ;;  %v806_v27 = vmul.f32 0.00390625, %v794_v24  ;;  %v1910_v30 = vmul.f32 0.00390625, %v777_v25  ;;  %v382_v24 = vld [vmem:[%s2247_s3 + $0x18] sm:$0xff] }
 0x24d   : > { %v821_v32 = vadd.f32 1e-05, %v817_v26  ;;  %v814_v33 = vsub.f32 %v806_v27, %v810_v29  ;;  %v833_v34 = vsub.f32 %v1874_v60, %v1910_v30  ;;  %v811_v35 = vmul.f32 %v1910_v30, %v1910_v30  ;;  %v386_v26 = vld [vmem:[%s2248_s4 + $0x18] sm:$0xff] }
 0x24e   : > { %v797_v36 = vpop.xlane.xlu1 %796  ;;  %v780_v37 = vpop.xlane.xlu0 %779  ;;  %v834_v38 = vsub.f32 %v1876_v61, %v1910_v30 }
 0x24f   : > { %1566 = vrsqrt.f32 %v821_v32  ;;  %v818_v39 = vmax.f32 %v814_v33, 0.0  ;;  %v807_v40 = vmul.f32 0.00390625, %v797_v36  ;;  %v1918_v41 = vmul.f32 0.00390625, %v780_v37 }
 0x251   : > { %v822_v42 = vadd.f32 1e-05, %v818_v39  ;;  %v815_v43 = vsub.f32 %v807_v40, %v811_v35  ;;  %v835_v44 = vsub.f32 %v1880_v63, %v1918_v41  ;;  %v836_v50 = vsub.f32 %v1886_v3, %v1918_v41 }
 0x252   : > { %v800_v48 = vpop.xlane.xlu0 %799  ;;  %v812_v51 = vmul.f32 %v1918_v41, %v1918_v41 }
 0x253   : > { %1568 = vrsqrt.f32 %v822_v42  ;;  %v808_v54 = vmul.f32 0.00390625, %v800_v48  ;;  %v819_v55 = vmax.f32 %v815_v43, 0.0 }
 0x255   : > { %v816_v56 = vsub.f32 %v808_v54, %v812_v51  ;;  %v823_v62 = vadd.f32 1e-05, %v819_v55 }
 0x257   : > { %v820_v0 = vmax.f32 %v816_v56, 0.0  ;;  %1570 = vrsqrt.f32 %v823_v62 }
 0x259   : > { %v1567_v59 = vpop.eup %1566  ;;  %v824_v6 = vadd.f32 1e-05, %v820_v0 }
 0x25a   : > { %v837_v2 = vmul.f32 %v1567_v59, %v379_v57 }
 0x25b   : > { %1572 = vrsqrt.f32 %v824_v6 }
 0x25c   : > { %843 = vperm.xlu1 %1548, %v837_v2  }
 0x25d   : > { %v1569_v5 = vpop.eup %1568 }
 0x25e   : > { %v838_v11 = vmul.f32 %v1569_v5, %v380_v4 }
 0x260   : > { %871 = vperm.xlu1 %1548, %v383_v8   ;;  %848 = vperm.xlu0 %1549, %v838_v11  }
 0x261   : > { %v1571_v18 = vpop.eup %1570 }
 0x262   : > { %v839_v20 = vmul.f32 %v1571_v18, %v381_v19 }
 0x264   : > { %876 = vperm.xlu1 %1548, %v384_v12  }
 0x265   : > { %v1573_v23 = vpop.eup %1572 }
 0x266   : > { %v840_v25 = vmul.f32 %v1573_v23, %v382_v24 }
 0x268   : > { %881 = vperm.xlu1 %1548, %v385_v14  }
 0x26c   : > { %853 = vperm.xlu1 %1548, %v839_v20  }
 0x270   : > { %858 = vperm.xlu1 %1548, %v840_v25  }
 0x274   : > { %886 = vperm.xlu1 %1548, %v386_v26  }
 0x2db   : > { %v844_v27 = vpop.permute.xlu1 %843 }
 0x2dc   : > { %v861_v29 = vmul.f32 %v844_v27, %v829_v16  ;;  %v862_v32 = vmul.f32 %v844_v27, %v830_v17 }
 0x2df   : > { %v872_v33 = vpop.permute.xlu1 %871  ;;  %v849_v35 = vpop.permute.xlu0 %848 }
 0x2e0   : > { %v889_v36 = vadd.f32 %v872_v33, %v861_v29  ;;  %v890_v37 = vadd.f32 %v872_v33, %v862_v32  ;;  %v863_v39 = vmul.f32 %v849_v35, %v831_v21  ;;  %v864_v40 = vmul.f32 %v849_v35, %v832_v22 }
 0x2e2   : > { %v897_v42 = vmax.f32 %v889_v36, 0.0  ;;  %v898_v43 = vmax.f32 %v890_v37, 0.0 }
 0x2e3   : > { %v877_v45 = vpop.permute.xlu1 %876 }
 0x2e4   : > { %v891_v16 = vadd.f32 %v877_v45, %v863_v39  ;;  %v892_v48 = vadd.f32 %v877_v45, %v864_v40  ;;  %v921_v17 = vmul.f32 %v897_v42, %v1685_v7  ;;  %v922_v54 = vmul.f32 %v898_v43, %v1688_v9 }
 0x2e5   : > { %v910_v15 = vmul.f32 %v898_v43, %v1708_v28  ;;  %v909_v56 = vmul.f32 %v897_v42, %v1716_v31 }
 0x2e6   : > { %v899_v51 = vmax.f32 %v891_v16, 0.0  ;;  %v900_v46 = vmax.f32 %v892_v48, 0.0 }
 0x2e7   : > { %v882_v13 = vpop.permute.xlu1 %881 }
 0x2e8   : > { %v923_v55 = vmul.f32 %v899_v51, %v1685_v7  ;;  %v924_v49 = vmul.f32 %v900_v46, %v1688_v9  ;;  %v1966_v21 = vpack.c.bf16 %v900_v46, %v898_v43  ;;  %v1968_v53 = vpack.c.bf16 %v899_v51, %v897_v42 }
 0x2e9   : > { %v912_v22 = vmul.f32 %v900_v46, %v1708_v28  ;;  %v911_v57 = vmul.f32 %v899_v51, %v1716_v31 }
 0x2ea   : > { %v929_v59 = vpack.c.bf16 %v923_v55, %v921_v17  ;;  %v930_v62 = vpack.c.bf16 %v924_v49, %v922_v54 }
 0x2eb   : > { %v854_v0 = vpop.permute.xlu1 %853  ;;  %v918_v2 = vpack.c.bf16 %v912_v22, %v910_v15  ;;  %v917_v4 = vpack.c.bf16 %v911_v57, %v909_v56 }
 0x2ec   : > { %v865_v5 = vmul.f32 %v854_v0, %v833_v34  ;;  %v866_v6 = vmul.f32 %v854_v0, %v834_v38  ;;  %937 = vrot.lane.b32.xlu1 %v929_v59, %s1598_s20 }
 0x2ee   : > { %v893_v8 = vadd.f32 %v882_v13, %v865_v5  ;;  %v894_v11 = vadd.f32 %v882_v13, %v866_v6 }
 0x2ef   : > { %v859_v12 = vpop.permute.xlu1 %858 }
 0x2f0   : > { %939 = vrot.lane.b32.xlu1 %v930_v62, %s1598_s20  ;;  %v867_v14 = vmul.f32 %v859_v12, %v835_v44  ;;  %v868_v60 = vmul.f32 %v859_v12, %v836_v50  ;;  %v901_v34 = vmax.f32 %v893_v8, 0.0  ;;  %v902_v18 = vmax.f32 %v894_v11, 0.0 }
 0x2f2   : > { %v925_v23 = vmul.f32 %v901_v34, %v1685_v7  ;;  %v926_v24 = vmul.f32 %v902_v18, %v1688_v9  ;;  %v914_v3 = vmul.f32 %v902_v18, %v1708_v28  ;;  %v913_v50 = vmul.f32 %v901_v34, %v1716_v31 }
 0x2f3   : > { %v887_v19 = vpop.permute.xlu1 %886 }
 0x2f4   : > { %v895_v61 = vadd.f32 %v887_v19, %v867_v14  ;;  %v896_v30 = vadd.f32 %v887_v19, %v868_v60 }
 0x2f6   : > { %v903_v38 = vmax.f32 %v895_v61, 0.0  ;;  %v904_v20 = vmax.f32 %v896_v30, 0.0  ;;  %v1558_v61 = vld [vmem:[%s2246_s2] ss:$12 sps:$4 sm:$0xff]   ;;  %v1561_v30 = vld [vmem:[%s2246_s2 + $0x1c] ss:$12 sps:$4 sm:$0xff]  }
 0x2f8   : > { %v927_v25 = vmul.f32 %v903_v38, %v1685_v7  ;;  %v928_v63 = vmul.f32 %v904_v20, %v1688_v9  ;;  %v1992_v44 = vpack.c.bf16 %v904_v20, %v902_v18  ;;  %v1994_v26 = vpack.c.bf16 %v903_v38, %v901_v34  ;;  %v1560_v7 = vld [vmem:[%s2246_s2 + $0x4] ss:$12 sps:$4 sm:$0xff]  }
 0x2f9   : > { %v916_v41 = vmul.f32 %v904_v20, %v1708_v28  ;;  %v915_v27 = vmul.f32 %v903_v38, %v1716_v31  ;;  %1157 = vmatprep.mubr.bf16.mxu1 %v1560_v7 }
 0x2fa   : > { %v931_v29 = vpack.c.bf16 %v927_v25, %v925_v23  ;;  %v932_v32 = vpack.c.bf16 %v928_v63, %v926_v24  ;;  %v1563_v25 = vld [vmem:[%s2246_s2 + $0x18] ss:$12 sps:$4 sm:$0xff]   ;;  %v1564_v63 = vld [vmem:[%s2246_s2 + $0x8] ss:$12 sps:$4 sm:$0xff]  }
 0x2fb   : > { %v920_v33 = vpack.c.bf16 %v916_v41, %v914_v3  ;;  %v919_v35 = vpack.c.bf16 %v915_v27, %v913_v50 }
 0x2fc   : > { %941 = vrot.lane.b32.xlu0 %v931_v29, %s1598_s20  ;;  %943 = vrot.lane.b32.xlu1 %v932_v32, %s1598_s20 }
 0x300   : > { %961 = vrot.lane.b32.xlu1 %v1966_v21, %s1599_s23  ;;  %959 = vrot.lane.b32.xlu0 %v1968_v53, %s1599_s23 }
 0x304   : > { %965 = vrot.lane.b32.xlu1 %v1992_v44, %s1599_s23  ;;  %963 = vrot.lane.b32.xlu0 %v1994_v26, %s1599_s23 }
 0x308   : > { %983 = vrot.lane.b32.xlu1 %v918_v2, %s1600_s24  ;;  %981 = vrot.lane.b32.xlu0 %v917_v4, %s1600_s24 }
 0x30c   : > { %987 = vrot.lane.b32.xlu1 %v920_v33, %s1600_s24  ;;  %985 = vrot.lane.b32.xlu0 %v919_v35, %s1600_s24 }
 0x310   : > { %1001 = vrot.lane.b32.xlu1 %v930_v62, %s1601_s25  ;;  %999 = vrot.lane.b32.xlu0 %v929_v59, %s1601_s25 }
 0x314   : > { %1005 = vrot.lane.b32.xlu1 %v932_v32, %s1601_s25  ;;  %1003 = vrot.lane.b32.xlu0 %v931_v29, %s1601_s25 }
 0x318   : > { %1019 = vrot.lane.b32.xlu1 %v918_v2, %s1602_s26  ;;  %1017 = vrot.lane.b32.xlu0 %v917_v4, %s1602_s26 }
 0x31c   : > { %1023 = vrot.lane.b32.xlu1 %v920_v33, %s1602_s26  ;;  %1021 = vrot.lane.b32.xlu0 %v919_v35, %s1602_s26 }
 0x320   : > { %1037 = vrot.lane.b32.xlu1 %v930_v62, %s1603_s27  ;;  %1035 = vrot.lane.b32.xlu0 %v929_v59, %s1603_s27 }
 0x324   : > { %1041 = vrot.lane.b32.xlu1 %v932_v32, %s1603_s27  ;;  %1039 = vrot.lane.b32.xlu0 %v931_v29, %s1603_s27 }
 0x328   : > { %1055 = vrot.lane.b32.xlu1 %v1966_v21, %s1604_s28  ;;  %1053 = vrot.lane.b32.xlu0 %v1968_v53, %s1604_s28 }
 0x32c   : > { %1059 = vrot.lane.b32.xlu1 %v1992_v44, %s1604_s28  ;;  %1057 = vrot.lane.b32.xlu0 %v1994_v26, %s1604_s28 }
 0x330   : > { %1073 = vrot.lane.b32.xlu1 %v918_v2, %s1605_s11  ;;  %1071 = vrot.lane.b32.xlu0 %v917_v4, %s1605_s11 }
 0x334   : > { %1077 = vrot.lane.b32.xlu1 %v920_v33, %s1605_s11  ;;  %1075 = vrot.lane.b32.xlu0 %v919_v35, %s1605_s11 }
 0x35e   : > { %v938_v9 = vpop.permute.xlu1 %937 }
 0x362   : > { %v940_v28 = vpop.permute.xlu1 %939 }
 0x363   : > { %v945_v31 = vsel %vm465_vm0, %v938_v9, %v940_v28 }
 0x364   : > { %1125 = vmatprep.subr.bf16.mxu1 %v945_v31 }
 0x365   : > { %1486 = vmatpush1.bf16.msk.msra.mxu1 %vm1772_vm1, %v938_v9 }
 0x36e   : > { %v944_v36 = vpop.permute.xlu1 %943  ;;  %v942_v37 = vpop.permute.xlu0 %941 }
 0x36f   : > { %v946_v39 = vsel %vm465_vm0, %v942_v37, %v944_v36 }
 0x370   : > { %1127 = vmatprep.subr.bf16.mxu1 %v946_v39 }
 0x371   : > { %1488 = vmatpush1.bf16.msk.msra.mxu1 %vm1772_vm1, %v942_v37 }
 0x372   : > { %v962_v40 = vpop.permute.xlu1 %961  ;;  %v960_v42 = vpop.permute.xlu0 %959 }
 0x373   : > { %v967_v43 = vsel %vm490_vm2, %v960_v42, %v962_v40 }
 0x374   : > { %1129 = vmatprep.subr.bf16.mxu1 %v967_v43 }
 0x375   : > { %1490 = vmatpush1.bf16.msk.msra.mxu1 %vm1784_vm3, %v960_v42 }
 0x376   : > { %v966_v45 = vpop.permute.xlu1 %965  ;;  %v964_v16 = vpop.permute.xlu0 %963 }
 0x377   : > { %v968_v48 = vsel %vm490_vm2, %v964_v16, %v966_v45 }
 0x378   : > { %1131 = vmatprep.subr.bf16.mxu1 %v968_v48 }
 0x379   : > { %1492 = vmatpush1.bf16.msk.msra.mxu1 %vm1784_vm3, %v964_v16 }
 0x37a   : > { %v984_v51 = vpop.permute.xlu1 %983  ;;  %v982_v46 = vpop.permute.xlu0 %981 }
 0x37b   : > { %v989_v52 = vsel %vm514_vm4, %v982_v46, %v984_v51 }
 0x37c   : > { %1133 = vmatprep.subr.bf16.mxu1 %v989_v52  ;;  %v391_v52 = vld [vmem:[%s2250_s6] sm:$0xff] }
 0x37d   : > { %1494 = vmatpush1.bf16.msk.msra.mxu1 %vm1795_vm5, %v982_v46  ;;  %v392_v46 = vld [vmem:[%s2250_s6 + $0x8] sm:$0xff] }
 0x37e   : > { %v988_v13 = vpop.permute.xlu1 %987  ;;  %v986_v17 = vpop.permute.xlu0 %985 }
 0x37f   : > { %v990_v54 = vsel %vm514_vm4, %v986_v17, %v988_v13 }
 0x380   : > { %1135 = vmatprep.subr.bf16.mxu1 %v990_v54 }
 0x381   : > { %1496 = vmatpush1.bf16.msk.msra.mxu1 %vm1795_vm5, %v986_v17 }
 0x382   : > { %v1002_v55 = vpop.permute.xlu1 %1001  ;;  %v1000_v49 = vpop.permute.xlu0 %999 }
 0x383   : > { %v1007_v58 = vsel %vm534_vm6, %v1000_v49, %v1002_v55 }
 0x384   : > { %1137 = vmatprep.subr.bf16.mxu1 %v1007_v58 }
 0x385   : > { %1498 = vmatpush1.bf16.msk.msra.mxu1 %vm1806_vm7, %v1000_v49 }
 0x386   : > { %v1006_v15 = vpop.permute.xlu1 %1005  ;;  %v1004_v22 = vpop.permute.xlu0 %1003 }
 0x387   : > { %v1008_v56 = vsel %vm534_vm6, %v1004_v22, %v1006_v15 }
 0x388   : > { %1139 = vmatprep.subr.bf16.mxu1 %v1008_v56 }
 0x389   : > { %1500 = vmatpush1.bf16.msk.msra.mxu1 %vm1806_vm7, %v1004_v22 }
 0x38a   : > { %v1020_v57 = vpop.permute.xlu1 %1019  ;;  %1141 = vmatprep.subr.bf16.mxu1 %v1966_v21  ;;  %v1018_v1 = vpop.permute.xlu0 %1017 }
 0x38b   : > { %v1025_v4 = vsel %vm554_vm8, %v1018_v1, %v1020_v57 }
 0x38d   : > { %1142 = vmatpush1.bf16.msra.mxu1 %v1968_v53 }
 0x38e   : > { %v1024_v59 = vpop.permute.xlu1 %1023  ;;  %1143 = vmatprep.subr.bf16.mxu1 %v1992_v44  ;;  %v1022_v62 = vpop.permute.xlu0 %1021  ;;  %v1565_v44 = vld [vmem:[%s2246_s2 + $0x20] ss:$12 sps:$4 sm:$0xff]  }
 0x38f   : > { %v1026_v5 = vsel %vm554_vm8, %v1022_v62, %v1024_v59 }
 0x391   : > { %1144 = vmatpush1.bf16.msra.mxu1 %v1994_v26 }
 0x392   : > { %v1038_v0 = vpop.permute.xlu1 %1037  ;;  %1501 = vmatprep.subr.msk.bf16.mxu1 %vm554_vm8, %v1020_v57  ;;  %v1036_v2 = vpop.permute.xlu0 %1035 }
 0x393   : > { %v1043_v8 = vsel %vm574_vm9, %v1036_v2, %v1038_v0 }
 0x395   : > { %1146 = vmatpush1.bf16.msra.mxu1 %v1025_v4 }
 0x396   : > { %v1042_v10 = vpop.permute.xlu1 %1041  ;;  %1502 = vmatprep.subr.msk.bf16.mxu1 %vm554_vm8, %v1024_v59  ;;  %v1040_v21 = vpop.permute.xlu0 %1039 }
 0x397   : > { %v1044_v11 = vsel %vm574_vm9, %v1040_v21, %v1042_v10 }
 0x399   : > { %1148 = vmatpush1.bf16.msra.mxu1 %v1026_v5 }
 0x39a   : > { %1503 = vmatprep.subr.msk.bf16.mxu1 %vm574_vm9, %v1038_v0  ;;  %v1056_v53 = vpop.permute.xlu1 %1055  ;;  %v1054_v6 = vpop.permute.xlu0 %1053 }
 0x39b   : > { %v1061_v60 = vsel %vm594_vm10, %v1054_v6, %v1056_v53 }
 0x39d   : > { %1150 = vmatpush1.bf16.msra.mxu1 %v1043_v8 }
 0x39e   : > { %1504 = vmatprep.subr.msk.bf16.mxu1 %vm574_vm9, %v1042_v10  ;;  %v1060_v12 = vpop.permute.xlu1 %1059  ;;  %v1058_v14 = vpop.permute.xlu0 %1057 }
 0x39f   : > { %v1062_v19 = vsel %vm594_vm10, %v1058_v14, %v1060_v12 }
 0x3a1   : > { %1152 = vmatpush1.bf16.msra.mxu1 %v1044_v11 }
 0x3a2   : > { %1505 = vmatprep.subr.msk.bf16.mxu1 %vm594_vm10, %v1056_v53  ;;  %v1074_v34 = vpop.permute.xlu1 %1073  ;;  %v1072_v18 = vpop.permute.xlu0 %1071 }
 0x3a3   : > { %v1079_v38 = vsel %vm614_vm11, %v1072_v18, %v1074_v34 }
 0x3a5   : > { %1154 = vmatpush1.bf16.msra.mxu1 %v1061_v60 }
 0x3a6   : > { %1506 = vmatprep.subr.msk.bf16.mxu1 %vm594_vm10, %v1060_v12  ;;  %v1078_v20 = vpop.permute.xlu1 %1077  ;;  %v1076_v23 = vpop.permute.xlu0 %1075 }
 0x3a7   : > { %v1080_v24 = vsel %vm614_vm11, %v1076_v23, %v1078_v20 }
 0x3a9   : > { %1156 = vmatpush1.bf16.msra.mxu1 %v1062_v19 }
 0x3aa   : > { %1507 = vmatprep.subr.msk.bf16.mxu1 %vm614_vm11, %v1074_v34 }
 0x3ac   : > { %1158 = vmatmul.mubr.bf16.vlgmr.msra.gmra.mrb[0].mxu1 %v1558_v61 }
 0x3ad   : > { %1179 = vmatpush1.bf16.msra.mxu1 %v1079_v38  ;;  %1167 = vmatprep.mubr.bf16.mxu1 %v1561_v30 }
 0x3ae   : > { %1508 = vmatprep.subr.msk.bf16.mxu1 %vm614_vm11, %v1078_v20 }
 0x3b1   : > { %1181 = vmatpush1.bf16.msra.mxu1 %v1080_v24 }
 0x3b4   : > { %1168 = vmatmul.mubr.bf16.gmra.mrb[4].mxu1 %v1563_v25 }
 0x3b5   : > { %1210 = vmatprep.mubr.bf16.mxu1 %v1606_v47 }
 0x3bc   : > { %1509 = vmatmul.mubr.msk.bf16.vlgmr.msra.gmra.mrb[0].mxu1 %vm656_vm12, %v1564_v63 }
 0x3bd   : > { %1220 = vmatprep.mubr.bf16.mxu1 %v1606_v47 }
 0x3c4   : > { %1510 = vmatmul.mubr.msk.bf16.gmra.mrb[4].mxu1 %vm656_vm12, %v1565_v44 }
 0x48f   : > { %v2104_v26 = vpop.f32.mrb[0].mxu1 }
 0x490   : > { %v2106_v3 = vpop.f32.mrb[1].mxu1  ;;  %v1243_v41 = vmul.f32 %v2104_v26, %v2104_v26 }
 0x491   : > { %v2110_v50 = vpop.f32.mrb[2].mxu1  ;;  %v1231_v27 = vadd.f32 %v2106_v3, %v2104_v26  ;;  %v1244_v47 = vmul.f32 %v2106_v3, %v2106_v3 }
 0x492   : > { %v2116_v29 = vpop.f32.mrb[3].mxu1  ;;  %v1245_v32 = vmul.f32 %v2110_v50, %v2110_v50 }
 0x493   : > { %1232 = vadd.xlane.f32.xlu0 %v1231_v27  ;;  %v1234_v33 = vadd.f32 %v2116_v29, %v2110_v50  ;;  %v1246_v35 = vmul.f32 %v2116_v29, %v2116_v29  ;;  %v1251_v7 = vadd.f32 %v1244_v47, %v1243_v41 }
 0x495   : > { %1235 = vadd.xlane.f32.xlu1 %v1234_v33  ;;  %v1254_v9 = vadd.f32 %v1246_v35, %v1245_v32 }
 0x497   : > { %1255 = vadd.xlane.f32.xlu0 %v1254_v9  ;;  %v2124_v28 = vpop.f32.mrb[4].mxu1  ;;  %v389_v9 = vld [vmem:[%s2249_s5 + $0x10] sm:$0xff] }
 0x498   : > { %v2126_v31 = vpop.f32.mrb[5].mxu1  ;;  %v1247_v36 = vmul.f32 %v2124_v28, %v2124_v28 }
 0x499   : > { %1252 = vadd.xlane.f32.xlu1 %v1251_v7  ;;  %v2130_v37 = vpop.f32.mrb[6].mxu1  ;;  %v1237_v39 = vadd.f32 %v2126_v31, %v2124_v28  ;;  %v1248_v40 = vmul.f32 %v2126_v31, %v2126_v31  ;;  %v393_v7 = vld [vmem:[%s2250_s6 + $0x10] sm:$0xff] }
 0x49a   : > { %v2136_v42 = vpop.f32.mrb[7].mxu1  ;;  %v1249_v43 = vmul.f32 %v2130_v37, %v2130_v37 }
 0x49b   : > { %v1250_v45 = vmul.f32 %v2136_v42, %v2136_v42  ;;  %1238 = vadd.xlane.f32.xlu0 %v1237_v39  ;;  %v1257_v16 = vadd.f32 %v1248_v40, %v1247_v36  ;;  %v1240_v48 = vadd.f32 %v2136_v42, %v2130_v37  ;;  %v390_v40 = vld [vmem:[%s2249_s5 + $0x18] sm:$0xff] }
 0x49d   : > { %1258 = vadd.xlane.f32.xlu1 %v1257_v16  ;;  %v1260_v51 = vadd.f32 %v1250_v45, %v1249_v43  ;;  %v394_v16 = vld [vmem:[%s2250_s6 + $0x18] sm:$0xff] }
 0x49f   : > { %1241 = vadd.xlane.f32.xlu0 %v1240_v48 }
 0x4a3   : > { %1261 = vadd.xlane.f32.xlu0 %v1260_v51 }
 0x4ae   : > { %1338 = vperm.xlu1 %1548, %v392_v46  }
 0x4b9   : > { %1333 = vperm.xlu0 %1549, %v391_v52  }
 0x520   : > { %v1233_v13 = vpop.xlane.xlu0 %1232 }
 0x521   : > { %v2150_v17 = vmul.f32 0.00390625, %v1233_v13 }
 0x522   : > { %v1236_v54 = vpop.xlane.xlu1 %1235 }
 0x523   : > { %v2152_v55 = vmul.f32 0.00390625, %v1236_v54  ;;  %v1291_v49 = vsub.f32 %v2104_v26, %v2150_v17  ;;  %v1292_v58 = vsub.f32 %v2106_v3, %v2150_v17  ;;  %v1271_v0 = vmul.f32 %v2150_v17, %v2150_v17  ;;  %v1584_v17 = vld [vmem:[%s1681_s19] sm:$0xff] }
 0x524   : > { %v1256_v15 = vpop.xlane.xlu0 %1255 }
 0x525   : > { %v1268_v22 = vmul.f32 0.00390625, %v1256_v15  ;;  %v1272_v56 = vmul.f32 %v2152_v55, %v2152_v55  ;;  %v1293_v57 = vsub.f32 %v2110_v50, %v2152_v55  ;;  %v1294_v1 = vsub.f32 %v2116_v29, %v2152_v55  ;;  %v388_v50 = vld [vmem:[%s2249_s5 + $0x8] sm:$0xff]  ;;  %v387_v29 = vld [vmem:[%s2249_s5] sm:$0xff] }
 0x526   : > { %v1253_v59 = vpop.xlane.xlu1 %1252 }
 0x527   : > { %v1276_v62 = vsub.f32 %v1268_v22, %v1272_v56  ;;  %v1267_v2 = vmul.f32 0.00390625, %v1253_v59  ;;  %v1582_v59 = vld [vmem:[%s1681_s19 + $0x10] sm:$0xff] }
 0x528   : > { %v1239_v4 = vpop.xlane.xlu0 %1238 }
 0x529   : > { %v1280_v10 = vmax.f32 %v1276_v62, 0.0  ;;  %v1275_v21 = vsub.f32 %v1267_v2, %v1271_v0  ;;  %v2166_v5 = vmul.f32 0.00390625, %v1239_v4  ;;  %v1583_v0 = vld [vmem:[%s1681_s19 + $0x18] sm:$0xff] }
 0x52a   : > { %v1259_v53 = vpop.xlane.xlu1 %1258 }
 0x52b   : > { %v1284_v6 = vadd.f32 1e-05, %v1280_v10  ;;  %v1279_v8 = vmax.f32 %v1275_v21, 0.0  ;;  %v1269_v11 = vmul.f32 0.00390625, %v1259_v53  ;;  %v1273_v12 = vmul.f32 %v2166_v5, %v2166_v5 }
 0x52c   : > { %v1242_v14 = vpop.xlane.xlu0 %1241  ;;  %v1295_v60 = vsub.f32 %v2124_v28, %v2166_v5  ;;  %v1296_v34 = vsub.f32 %v2126_v31, %v2166_v5 }
 0x52d   : > { %1574 = vrsqrt.f32 %v1284_v6  ;;  %v1283_v18 = vadd.f32 1e-05, %v1279_v8  ;;  %v1277_v19 = vsub.f32 %v1269_v11, %v1273_v12  ;;  %v2174_v61 = vmul.f32 0.00390625, %v1242_v14 }
 0x52e   : > { %v1339_v51 = vpop.permute.xlu1 %1338 }
 0x52f   : > { %1576 = vrsqrt.f32 %v1283_v18  ;;  %v1281_v30 = vmax.f32 %v1277_v19, 0.0  ;;  %v1297_v38 = vsub.f32 %v2130_v37, %v2174_v61  ;;  %v1298_v23 = vsub.f32 %v2136_v42, %v2174_v61  ;;  %v1586_v18 = vld [vmem:[%s1681_s19 + $0x20] sm:$0xff] }
 0x530   : > { %v1262_v20 = vpop.xlane.xlu0 %1261  ;;  %v1274_v25 = vmul.f32 %v2174_v61, %v2174_v61 }
 0x531   : > { %v1285_v24 = vadd.f32 1e-05, %v1281_v30  ;;  %v1270_v63 = vmul.f32 0.00390625, %v1262_v20 }
 0x533   : > { %1578 = vrsqrt.f32 %v1285_v24  ;;  %v1278_v44 = vsub.f32 %v1270_v63, %v1274_v25 }
 0x535   : > { %v1282_v41 = vmax.f32 %v1278_v44, 0.0  ;;  %v1588_v44 = vld [vmem:[%s1681_s19 + $0x30] sm:$0xff] }
 0x537   : > { %v1575_v27 = vpop.eup %1574  ;;  %v1286_v47 = vadd.f32 1e-05, %v1282_v41 }
 0x538   : > { %v1300_v32 = vmul.f32 %v1575_v27, %v388_v50  ;;  %v1334_v48 = vpop.permute.xlu0 %1333  ;;  %v1589_v50 = vld [vmem:[%s1681_s19 + $0x38] sm:$0xff] }
 0x539   : > { %v1577_v33 = vpop.eup %1576  ;;  %1580 = vrsqrt.f32 %v1286_v47 }
 0x53a   : > { %1310 = vperm.xlu0 %1549, %v1300_v32   ;;  %v1299_v35 = vmul.f32 %v1577_v33, %v387_v29 }
 0x53c   : > { %1305 = vperm.xlu1 %1548, %v1299_v35  }
 0x53d   : > { %v1579_v36 = vpop.eup %1578 }
 0x53e   : > { %1343 = vperm.xlu0 %1549, %v393_v7   ;;  %v1301_v39 = vmul.f32 %v1579_v36, %v389_v9 }
 0x540   : > { %1315 = vperm.xlu1 %1548, %v1301_v39  }
 0x543   : > { %v1581_v43 = vpop.eup %1580 }
 0x544   : > { %v1302_v45 = vmul.f32 %v1581_v43, %v390_v40 }
 0x546   : > { %1320 = vperm.xlu1 %1548, %v1302_v45  }
 0x54a   : > { %1348 = vperm.xlu1 %1548, %v394_v16  }
 0x5b9   : > { %v1311_v46 = vpop.permute.xlu0 %1310 }
 0x5ba   : > { %v1325_v52 = vmul.f32 %v1311_v46, %v1293_v57  ;;  %v1326_v13 = vmul.f32 %v1311_v46, %v1294_v1  ;;  %v1585_v1 = vld [vmem:[%s1681_s19 + $0x8] sm:$0xff] }
 0x5bb   : > { %v1306_v54 = vpop.permute.xlu1 %1305 }
 0x5bc   : > { %v1353_v55 = vadd.f32 %v1339_v51, %v1325_v52  ;;  %v1354_v15 = vadd.f32 %v1339_v51, %v1326_v13  ;;  %v1323_v22 = vmul.f32 %v1306_v54, %v1291_v49  ;;  %v1324_v56 = vmul.f32 %v1306_v54, %v1292_v58 }
 0x5bd   : > { %v1344_v11 = vpop.permute.xlu0 %1343 }
 0x5be   : > { %v1361_v62 = vadd.f32 %v1582_v59, %v1353_v55  ;;  %v1362_v2 = vadd.f32 %v1583_v0, %v1354_v15  ;;  %v1351_v4 = vadd.f32 %v1334_v48, %v1323_v22  ;;  %v1352_v57 = vadd.f32 %v1334_v48, %v1324_v56 }
 0x5bf   : > { %v1316_v26 = vpop.permute.xlu1 %1315 }
 0x5c0   : > { %v1369_v49 = vmax.f32 %v1361_v62, 0.0  ;;  %v1370_v3 = vmax.f32 %v1362_v2, 0.0  ;;  %v1359_v58 = vadd.f32 %v1584_v17, %v1351_v4  ;;  %v1360_v10 = vadd.f32 %v1585_v1, %v1352_v57 }
 0x5c1   : > { %v1327_v21 = vmul.f32 %v1316_v26, %v1295_v60  ;;  %v1328_v53 = vmul.f32 %v1316_v26, %v1296_v34  ;;  %v1587_v60 = vld [vmem:[%s1681_s19 + $0x28] sm:$0xff] }
 0x5c2   : > { %1377 = vst [vmem:[%s2213_s18 + $0x10] sm:$0xff] %v1369_v49  ;;  %1378 = vst [vmem:[%s2213_s18 + $0x18] sm:$0xff] %v1370_v3  ;;  %v1367_v6 = vmax.f32 %v1359_v58, 0.0  ;;  %v1368_v8 = vmax.f32 %v1360_v10, 0.0 }
 0x5c3   : > { %v1355_v12 = vadd.f32 %v1344_v11, %v1327_v21  ;;  %v1356_v14 = vadd.f32 %v1344_v11, %v1328_v53 }
 0x5c4   : > { %1375 = vst [vmem:[%s2213_s18] sm:$0xff] %v1367_v6  ;;  %1376 = vst [vmem:[%s2213_s18 + $0x8] sm:$0xff] %v1368_v8 }
 0x5c5   : > { %v1363_v28 = vadd.f32 %v1586_v18, %v1355_v12  ;;  %v1364_v19 = vadd.f32 %v1587_v60, %v1356_v14  ;;  %v1321_v30 = vpop.permute.xlu1 %1320 }
 0x5c6   : > { %v1329_v34 = vmul.f32 %v1321_v30, %v1297_v38  ;;  %v1330_v20 = vmul.f32 %v1321_v30, %v1298_v23 }
 0x5c7   : > { %v1371_v31 = vmax.f32 %v1363_v28, 0.0  ;;  %v1372_v5 = vmax.f32 %v1364_v19, 0.0 }
 0x5c9   : > { %1379 = vst [vmem:[%s2213_s18 + $0x20] sm:$0xff] %v1371_v31  ;;  %1380 = vst [vmem:[%s2213_s18 + $0x28] sm:$0xff] %v1372_v5  ;;  %v1349_v24 = vpop.permute.xlu1 %1348 }
 0x5ca   : > { %v1357_v25 = vadd.f32 %v1349_v24, %v1329_v34  ;;  %v1358_v63 = vadd.f32 %v1349_v24, %v1330_v20 }
 0x5cc   : > { %v1365_v41 = vadd.f32 %v1588_v44, %v1357_v25  ;;  %v1366_v27 = vadd.f32 %v1589_v50, %v1358_v63 }
 0x5ce   : > { %v1373_v47 = vmax.f32 %v1365_v41, 0.0  ;;  %v1374_v29 = vmax.f32 %v1366_v27, 0.0 }
 0x5d0   : > { %1381 = vst [vmem:[%s2213_s18 + $0x30] sm:$0xff] %v1373_v47  ;;  %1382 = vst [vmem:[%s2213_s18 + $0x38] sm:$0xff] %v1374_v29 }
 0x5d1 PF: > { %s20_s13 = sadd.s32 1, %s1596_s13  }
 0x5d2   : > { %p17_p4 = scmp.ge.s32.totalorder %s20_s13, 4  }
 0x5d4   :  { %19 = sbr.rel (!%p17_p4) target bundleno = 1 (0x1), region = 90 }

</bundles_post_ra>
